<compile_context>
chip_gen: v7x
topology: tpu7x:2x2x1
jax: 0.10.0
libtpu: 0.0.40
codegen_flags: <defaults>
</compile_context>

<pallas_src>
import functools

import jax
import jax.numpy as jnp
from jax.experimental import pallas as pl
from jax.experimental.pallas import tpu as pltpu


def _vmem_limits():
    """Single generation-aware constant: (vmem_limit_bytes, pipeline_buffer_budget)."""
    phys = None
    try:
        info = pltpu.get_tpu_info()
        phys = getattr(info, "vmem_capacity_bytes", None)
    except Exception:
        phys = None
    if not phys:
        phys = 64 * 1024 * 1024  # conservative fallback (v7x per-TC VMEM)
    limit = min(phys // 2, 64 * 1024 * 1024)  # v7x -> 32 MiB, v5e/v6e -> 64 MiB
    budget = (limit * 3) // 4                 # headroom for output + internal scratch
    return limit, budget


def _choose_batch_tile(batch, num_classes, itemsize, budget_bytes):
    # 2 inputs x 2 pipeline buffers x TB x C x itemsize must fit in the budget.
    per_row = 4 * num_classes * itemsize
    tb = budget_bytes // per_row
    tb = (tb // 16) * 16          # multiple of 16: valid for f32 (8,·) and bf16 (16,·) packing
    tb = max(16, tb)
    if tb >= batch:
        return batch              # single block == full batch dim (any size allowed)
    return tb


def _soft_target_kernel(s_ref, t_ref, out_ref, *, inv_temperature, batch, block_rows):
    # Load one (TB, C) batch tile; compute in float32 regardless of input dtype.
    s = s_ref[...].astype(jnp.float32) * inv_temperature
    t = t_ref[...].astype(jnp.float32) * inv_temperature

    # Ragged-tail mask: rows >= batch in the last block hold unspecified VMEM data
    # (we never jnp.pad in HBM). Sanitize BEFORE any exp/max/sum.
    row0 = pl.program_id(0) * block_rows
    rows = jax.lax.broadcasted_iota(jnp.int32, (block_rows, 1), 0) + row0
    valid = rows < batch                                  # (TB, 1)
    s = jnp.where(valid, s, 0.0)
    t = jnp.where(valid, t, 0.0)

    # Student log-softmax pieces (max-shifted); log deferred (fused below).
    s_max = jnp.max(s, axis=1, keepdims=True)
    s_shift = s - s_max
    s_sum = jnp.sum(jnp.exp(s_shift), axis=1, keepdims=True)

    # Teacher softmax pieces (max-shifted); normalization deferred to a (TB,1) column.
    t_max = jnp.max(t, axis=1, keepdims=True)
    t_shift = t - t_max
    t_exp = jnp.exp(t_shift)
    t_sum = jnp.sum(t_exp, axis=1, keepdims=True)
    inv_t_sum = pl.reciprocal(t_sum, approx=False)        # exact; keeps rtol=1e-5

    # KL(p_t || p_s) per row, using sum_c p_t = 1 and fused logs:
    #   sum_c p_t*(t_shift - s_shift) + (log s_sum - log t_sum)
    # = [sum_c t_exp*(t_shift - s_shift)] * inv_t_sum + log(s_sum * inv_t_sum)
    row_dot = jnp.sum(t_exp * (t_shift - s_shift), axis=1, keepdims=True)
    kl_row = row_dot * inv_t_sum + jnp.log(s_sum * inv_t_sum)
    kl_row = jnp.where(valid, kl_row, 0.0)                # exact-0 tail contribution

    # Per-block scalar: one (1,1,1) store instead of TB/8 masked lane-1 stores.
    out_ref[...] = jnp.sum(kl_row, axis=0, keepdims=True).reshape(1, 1, 1)


def soft_target_loss(out_s, out_t, T, block_rows=None):
    """Pallas TPU implementation of SoftTarget(T)(out_s, out_t). Returns scalar f32."""
    assert out_s.shape == out_t.shape and out_s.ndim == 2
    B, C = out_s.shape
    inv_T = 1.0 / float(T)

    vmem_limit, budget = _vmem_limits()
    tb = block_rows if block_rows is not None else _choose_batch_tile(
        B, C, out_s.dtype.itemsize, budget)
    num_blocks = pl.cdiv(B, tb)

    kernel = functools.partial(
        _soft_target_kernel, inv_temperature=inv_T, batch=B, block_rows=tb)

    partials = pl.pallas_call(
        kernel,
        out_shape=jax.ShapeDtypeStruct((num_blocks, 1, 1), jnp.float32),
        grid_spec=pltpu.PrefetchScalarGridSpec(
            num_scalar_prefetch=0,
            grid=(num_blocks,),
            in_specs=[
                pl.BlockSpec((tb, C), lambda i: (i, 0)),
                pl.BlockSpec((tb, C), lambda i: (i, 0)),
            ],
            out_specs=pl.BlockSpec((1, 1, 1), lambda i: (i, 0, 0)),
        ),
        compiler_params=pltpu.CompilerParams(
            dimension_semantics=("parallel",),
            vmem_limit_bytes=vmem_limit,
        ),
    )(out_s, out_t)

    # 'batchmean' over the ORIGINAL batch size, then * T^2.
    return jnp.sum(partials) / jnp.float32(B) * jnp.float32(T * T)


def soft_target_ref(out_s, out_t, T):
    """Pure-JAX reference (mirrors the PyTorch forward)."""
    log_p_s = jax.nn.log_softmax(out_s / T, axis=1)
    p_t = jax.nn.softmax(out_t / T, axis=1)
    kl = p_t * (jnp.log(p_t) - log_p_s)
    return jnp.sum(kl) / out_s.shape[0] * T * T


if __name__ == "__main__":
    key = jax.random.PRNGKey(0)
    k1, k2, k3, k4, k5, k6 = jax.random.split(key, 6)

    T = 3.0  # distillation temperature

    # Case 1: single full block.
    B, C = 8, 32
    out_s = jax.random.normal(k1, (B, C), dtype=jnp.float32) * 2.0
    out_t = jax.random.normal(k2, (B, C), dtype=jnp.float32) * 2.0
    loss = soft_target_loss(out_s, out_t, T)
    jax.block_until_ready(loss)
    ref = soft_target_ref(out_s, out_t, T)
    assert jnp.allclose(loss, ref, rtol=1e-5, atol=1e-5), (loss, ref)

    # Case 2: batch smaller than the sublane tile (block == full batch dim).
    B2, C2 = 5, 32
    out_s2 = jax.random.normal(k3, (B2, C2), dtype=jnp.float32) * 2.0
    out_t2 = jax.random.normal(k4, (B2, C2), dtype=jnp.float32) * 2.0
    loss2 = soft_target_loss(out_s2, out_t2, T)
    jax.block_until_ready(loss2)
    ref2 = soft_target_ref(out_s2, out_t2, T)
    assert jnp.allclose(loss2, ref2, rtol=1e-5, atol=1e-5), (loss2, ref2)

    # Case 3: multi-block grid with a ragged (masked) tail block — no jnp.pad.
    B3, C3 = 40, 32
    out_s3 = jax.random.normal(k5, (B3, C3), dtype=jnp.float32) * 2.0
    out_t3 = jax.random.normal(k6, (B3, C3), dtype=jnp.float32) * 2.0
    loss3 = soft_target_loss(out_s3, out_t3, T, block_rows=16)  # grid=3, last block partial
    jax.block_until_ready(loss3)
    ref3 = soft_target_ref(out_s3, out_t3, T)
    assert jnp.allclose(loss3, ref3, rtol=1e-5, atol=1e-5), (loss3, ref3)

    print("KERNEL_OK")
</pallas_src>

<mosaic_0001>
module attributes {stable_mosaic.version = 11 : i64} {
  func.func @_soft_target_kernel(%arg0: i32, %arg1: memref<8x32xf32, #tpu.memory_space<vmem>>, %arg2: memref<8x32xf32, #tpu.memory_space<vmem>>, %arg3: memref<1x1x1xf32, #tpu.memory_space<vmem>>) attributes {dimension_semantics = [#tpu.dimension_semantics<parallel>], iteration_bounds = array<i64: 1>, scalar_prefetch = 0 : i64, scratch_operands = 0 : i64, tpu.core_type = #tpu.core_type<tc>, window_params = [{transform_indices = @transform_0, window_bounds = array<i64: 8, 32>}, {transform_indices = @transform_1, window_bounds = array<i64: 8, 32>}, {transform_indices = @transform_2, window_bounds = array<i64: 1, 1, 1>}]} {
    %c0 = arith.constant 0 : index
    %c0_0 = arith.constant 0 : index
    %0 = vector.load %arg1[%c0, %c0_0] : memref<8x32xf32, #tpu.memory_space<vmem>>, vector<8x32xf32>
    %cst = arith.constant 0.333333343 : f32
    %1 = vector.broadcast %cst : f32 to vector<8x32xf32>
    %2 = arith.mulf %0, %1 : vector<8x32xf32>
    %c0_1 = arith.constant 0 : index
    %c0_2 = arith.constant 0 : index
    %3 = vector.load %arg2[%c0_1, %c0_2] : memref<8x32xf32, #tpu.memory_space<vmem>>, vector<8x32xf32>
    %cst_3 = arith.constant 0.333333343 : f32
    %4 = vector.broadcast %cst_3 : f32 to vector<8x32xf32>
    %5 = arith.mulf %3, %4 : vector<8x32xf32>
    %c8_i32 = arith.constant 8 : i32
    %6 = arith.muli %arg0, %c8_i32 : i32
    %7 = tpu.iota {dimensions = array<i32: 0>} : vector<8x1xi32>
    %8 = vector.broadcast %6 : i32 to vector<8x1xi32>
    %9 = arith.addi %7, %8 : vector<8x1xi32>
    %c8_i32_4 = arith.constant 8 : i32
    %10 = vector.broadcast %c8_i32_4 : i32 to vector<8x1xi32>
    %11 = arith.cmpi slt, %9, %10 : vector<8x1xi32>
    %cst_5 = arith.constant 0.000000e+00 : f32
    %12 = vector.shape_cast %11 : vector<8x1xi1> to vector<8x1xi1>
    %13 = vector.broadcast %12 : vector<8x1xi1> to vector<8x32xi1>
    %14 = vector.broadcast %cst_5 : f32 to vector<8x32xf32>
    %15 = arith.select %13, %2, %14 : vector<8x32xi1>, vector<8x32xf32>
    %cst_6 = arith.constant 0.000000e+00 : f32
    %16 = vector.shape_cast %11 : vector<8x1xi1> to vector<8x1xi1>
    %17 = vector.broadcast %16 : vector<8x1xi1> to vector<8x32xi1>
    %18 = vector.broadcast %cst_6 : f32 to vector<8x32xf32>
    %19 = arith.select %17, %5, %18 : vector<8x32xi1>, vector<8x32xf32>
    %cst_7 = arith.constant dense<0xFF800000> : vector<8xf32>
    %20 = vector.multi_reduction <maximumf>, %15, %cst_7 [1] : vector<8x32xf32> to vector<8xf32>
    %21 = vector.shape_cast %20 : vector<8xf32> to vector<8x1xf32>
    %22 = vector.broadcast %21 : vector<8x1xf32> to vector<8x32xf32>
    %23 = arith.subf %15, %22 : vector<8x32xf32>
    %24 = math.exp %23 : vector<8x32xf32>
    %cst_8 = arith.constant dense<0.000000e+00> : vector<8xf32>
    %25 = vector.multi_reduction <add>, %24, %cst_8 [1] : vector<8x32xf32> to vector<8xf32>
    %26 = vector.shape_cast %25 : vector<8xf32> to vector<8x1xf32>
    %cst_9 = arith.constant dense<0xFF800000> : vector<8xf32>
    %27 = vector.multi_reduction <maximumf>, %19, %cst_9 [1] : vector<8x32xf32> to vector<8xf32>
    %28 = vector.shape_cast %27 : vector<8xf32> to vector<8x1xf32>
    %29 = vector.broadcast %28 : vector<8x1xf32> to vector<8x32xf32>
    %30 = arith.subf %19, %29 : vector<8x32xf32>
    %31 = math.exp %30 : vector<8x32xf32>
    %cst_10 = arith.constant dense<0.000000e+00> : vector<8xf32>
    %32 = vector.multi_reduction <add>, %31, %cst_10 [1] : vector<8x32xf32> to vector<8xf32>
    %33 = vector.shape_cast %32 : vector<8xf32> to vector<8x1xf32>
    %34 = tpu.reciprocal %33 : vector<8x1xf32> -> vector<8x1xf32>
    %35 = arith.subf %30, %23 : vector<8x32xf32>
    %36 = arith.mulf %31, %35 : vector<8x32xf32>
    %cst_11 = arith.constant dense<0.000000e+00> : vector<8xf32>
    %37 = vector.multi_reduction <add>, %36, %cst_11 [1] : vector<8x32xf32> to vector<8xf32>
    %38 = vector.shape_cast %37 : vector<8xf32> to vector<8x1xf32>
    %39 = arith.mulf %38, %34 : vector<8x1xf32>
    %40 = arith.mulf %26, %34 : vector<8x1xf32>
    %41 = math.log %40 : vector<8x1xf32>
    %42 = arith.addf %39, %41 : vector<8x1xf32>
    %cst_12 = arith.constant 0.000000e+00 : f32
    %43 = vector.broadcast %cst_12 : f32 to vector<8x1xf32>
    %44 = arith.select %11, %42, %43 : vector<8x1xi1>, vector<8x1xf32>
    %cst_13 = arith.constant dense<0.000000e+00> : vector<1xf32>
    %45 = vector.multi_reduction <add>, %44, %cst_13 [0] : vector<8x1xf32> to vector<1xf32>
    %46 = vector.shape_cast %45 : vector<1xf32> to vector<1x1xf32>
    %47 = vector.shape_cast %46 : vector<1x1xf32> to vector<1x1x1xf32>
    %c0_14 = arith.constant 0 : index
    %c0_15 = arith.constant 0 : index
    %c0_16 = arith.constant 0 : index
    %48 = vector.load %arg3[%c0_14, %c0_15, %c0_16] : memref<1x1x1xf32, #tpu.memory_space<vmem>>, vector<1x1x1xf32>
    tpu.vector_store %arg3[%c0_14, %c0_15, %c0_16], %47 {strides = array<i32>} : memref<1x1x1xf32, #tpu.memory_space<vmem>>, vector<1x1x1xf32>,
    return
  }
  func.func @transform_0(%arg0: i32) -> (i32, i32) {
    %c0_i32 = arith.constant 0 : i32
    %c0_i32_0 = arith.constant 0 : i32
    return %arg0, %c0_i32 : i32, i32
  }
  func.func @transform_1(%arg0: i32) -> (i32, i32) {
    %c0_i32 = arith.constant 0 : i32
    %c0_i32_0 = arith.constant 0 : i32
    return %arg0, %c0_i32 : i32, i32
  }
  func.func @transform_2(%arg0: i32) -> (i32, i32, i32) {
    %c0_i32 = arith.constant 0 : i32
    %c0_i32_0 = arith.constant 0 : i32
    %c0_i32_1 = arith.constant 0 : i32
    return %arg0, %c0_i32, %c0_i32_0 : i32, i32, i32
  }
}

</mosaic_0001>

<bundles_post_ra>
// kernel: tpu_custom_call.1
= control target key start
LH: loop header
LB: loop body
LE: loop exit
PB: predicated region body
PF: predicated region fallthrough
CT: control target
= control target key end

     0   :  { %7 = vsyncpa [#allocation3], 0  ;;  %s247_s0 = inlined_call_operand.hbm [shape: f32[8,32], index: 0, kind: input, shape index: {}]   ;;  %s248_s1 = inlined_call_operand.hbm [shape: f32[8,32], index: 1, kind: input, shape index: {}]   ;;  %s249_s2 = inlined_call_operand.hbm [shape: f32[1,1,1], index: 2, kind: output, shape index: {}]  }
   0x1   :  { %8 = vsyncpa [#allocation6], 0 }
   0x2   :  { %9 = vsyncpa [#allocation4], 0  ;;  %s188_s9 = smov [#allocation2]   ;;  %s189_s11 = smov [#allocation5]  }
   0x3   :  { %s16_s10 = sshll.u32 %s188_s9, 4  ;;  %s26_s12 = sshll.u32 %s189_s11, 4  ;;  %s17_s10 = int_to_ptr.vmem [resolvable:$true] %s16_s10  ;;  %s27_s12 = int_to_ptr.vmem [resolvable:$true] %s26_s12 }
   0x4   :  { %s116_s15 = scalar_lea.hbm %s247_s0, 128 }
   0x5   :  { %p117_p0 = scmp.ne.s32.totalorder %s247_s0, %s116_s15  ;;  %p120_p1 = scmp.lt.u32.totalorder %s116_s15, %s247_s0 }
   0x7   :  { %p122_p2 = pnand %p120_p1, %p117_p0 }
   0x9   :  { %125 = shalt.err (!%p122_p2)
}
   0xa   :  { %s126_s20 = scalar_lea.vmem %s17_s10, 128  ;;  %p131_p4 = scmp.lt.s32.totalorder %s17_s10, %s17_s10 }
   0xb   :  { %p127_p3 = scmp.ne.s32.totalorder %s17_s10, %s126_s20  ;;  %p132_p5 = scmp.lt.s32.totalorder %s126_s20, %s126_s20 }
   0xd   :  { %p133_p6 = por %p132_p5, %p131_p4 }
   0xf   :  { %p134_p7 = pnand %p133_p6, %p127_p3 }
  0x11   :  { %137 = shalt.err (!%p134_p7)
}
  0x12   :  { %19 = dma.hbm_to_vmem [thread:$0]  %s247_s0, 128, %s17_s10, [#allocation3]  }
  0x13   :  { %s138_s25 = scalar_lea.hbm %s248_s1, 128 }
  0x14   :  { %p139_p8 = scmp.ne.s32.totalorder %s248_s1, %s138_s25  ;;  %p142_p9 = scmp.lt.u32.totalorder %s138_s25, %s248_s1 }
  0x16   :  { %p144_p10 = pnand %p142_p9, %p139_p8 }
  0x18   :  { %147 = shalt.err (!%p144_p10)
}
  0x19   :  { %s148_s30 = scalar_lea.vmem %s27_s12, 128  ;;  %p153_p12 = scmp.lt.s32.totalorder %s27_s12, %s27_s12 }
  0x1a   :  { %p149_p11 = scmp.ne.s32.totalorder %s27_s12, %s148_s30  ;;  %p154_p13 = scmp.lt.s32.totalorder %s148_s30, %s148_s30 }
  0x1c   :  { %p155_p0 = por %p154_p13, %p153_p12 }
  0x1e   :  { %p156_p1 = pnand %p155_p0, %p149_p11 }
  0x20   :  { %159 = shalt.err (!%p156_p1)
}
  0x21   :  { %29 = dma.hbm_to_vmem [thread:$0]  %s248_s1, 128, %s27_s12, [#allocation6]  }
  0x22   :  { %182 = dma.done.wait [#allocation3], 128  }
  0x23   :  { %183 = vsyncadd [#allocation3], 4294967168 }
  0x24   :  { %184 = dma.done.wait [#allocation6], 128  }
  0x25   :  { %185 = vsyncadd [#allocation6], 4294967168  ;;  %v38_v0 = vld [vmem:[#allocation5] sm:$0xff]  ;;  %vm50_vm0 = vcmask 261120   ;;  %v36_v1 = vld [vmem:[#allocation2] sm:$0xff]  ;;  %s190_s1 = smov [#allocation7]  }
  0x26   :  { %v39_v2 = vmul.f32 0.33333334, %v38_v0  ;;  %v37_v3 = vmul.f32 0.33333334, %v36_v1  ;;  %s95_s4 = sshll.u32 %s190_s1, 4  ;;  %vm87_vm1 = vcmask 0   ;;  %s96_s4 = int_to_ptr.vmem [resolvable:$true] %s95_s4 }
  0x27   :  { %s160_s5 = scalar_lea.vmem %s96_s4, 16  ;;  %s164_s6 = scalar_lea.vmem %s96_s4, 32 }
  0x28   :  { %v60_v4 = vsel %vm50_vm0, %v39_v2, -inf  ;;  %v51_v5 = vsel %vm50_vm0, %v37_v3, -inf  ;;  %p161_p2 = scmp.ne.s32.totalorder %s96_s4, %s160_s5  ;;  %p165_p3 = scmp.lt.s32.totalorder %s96_s4, %s96_s4 }
  0x29   :  { %61 = vmax.xlane.f32.xlu0 %v60_v4  ;;  %p166_p4 = scmp.lt.s32.totalorder %s164_s6, %s160_s5 }
  0x2b   :  { %p167_p5 = por %p166_p4, %p165_p3 }
  0x2d   :  { %52 = vmax.xlane.f32.xlu0 %v51_v5  ;;  %p168_p6 = pnand %p167_p5, %p161_p2 }
  0xb6   :  { %v62_v6 = vpop.xlane.xlu0 %61 }
  0xb7   :  { %v63_v7 = vsub.f32 %v39_v2, %v62_v6 }
  0xb9   :  { %v64_v8 = vmul.f32 1.442695, %v63_v7 }
  0xba   :  { %v53_v9 = vpop.xlane.xlu0 %52 }
  0xbb   :  { %108 = vpow2.f32 %v64_v8  ;;  %v54_v10 = vsub.f32 %v37_v3, %v53_v9 }
  0xbd   :  { %v55_v11 = vmul.f32 1.442695, %v54_v10  ;;  %v70_v12 = vsub.f32 %v63_v7, %v54_v10 }
  0xbf   :  { %110 = vpow2.f32 %v55_v11 }
  0xc5   :  { %v109_v13 = vpop.eup %108 }
  0xc6   :  { %v66_v14 = vsel %vm50_vm0, %v109_v13, 0.0  ;;  %v71_v15 = vmul.f32 %v109_v13, %v70_v12 }
  0xc7   :  { %67 = vadd.xlane.f32.xlu1 %v66_v14 }
  0xc8   :  { %v72_v16 = vsel %vm50_vm0, %v71_v15, 0.0 }
  0xc9   :  { %v111_v17 = vpop.eup %110  ;;  %73 = vadd.xlane.f32.xlu0 %v72_v16 }
  0xca   :  { %v57_v18 = vsel %vm50_vm0, %v111_v17, 0.0 }
  0xcb   :  { %58 = vadd.xlane.f32.xlu1 %v57_v18 }
 0x154   :  { %v68_v19 = vpop.xlane.xlu1 %67 }
 0x155   :  { %112 = vrcp.f32 %v68_v19 }
 0x156   :  { %v74_v24 = vpop.xlane.xlu0 %73 }
 0x158   :  { %v59_v20 = vpop.xlane.xlu1 %58 }
 0x15f   :  { %v113_v21 = vpop.eup %112 }
 0x160   :  { %v76_v22 = vmul.f32 %v113_v21, %v59_v20  ;;  %v75_v25 = vmul.f32 %v113_v21, %v74_v24 }
 0x162   :  { %114 = vlog2.f32 %v76_v22 }
 0x16c   :  { %v115_v23 = vpop.eup %114 }
 0x16d   :  { %v78_v26 = vmul.f32 0.6931472, %v115_v23 }
 0x16f   :  { %v79_v27 = vadd.f32 %v78_v26, %v75_v25 }
 0x171   :  { %v81_v28 = vrot.slane %v79_v27, 4 }
 0x173   :  { %v82_v29 = vadd.f32 %v81_v28, %v79_v27 }
 0x175   :  { %v83_v30 = vrot.slane %v82_v29, 2 }
 0x177   :  { %v84_v31 = vadd.f32 %v83_v30, %v82_v29 }
 0x179   :  { %v85_v32 = vrot.slane %v84_v31, 1 }
 0x17b   :  { %v86_v33 = vadd.f32 %v85_v32, %v84_v31 }
 0x17d   :  { %88 = vst.msk [vmem:[#allocation7] sm:$0x1] %vm87_vm1, %v86_v33 }
 0x17e   :  { %171 = shalt.err (!%p168_p6)
}
 0x17f   :  { %s172_s9 = scalar_lea.hbm %s249_s2, 16 }
 0x180   :  { %p173_p7 = scmp.ne.s32.totalorder %s249_s2, %s172_s9  ;;  %p176_p8 = scmp.lt.u32.totalorder %s172_s9, %s249_s2 }
 0x182   :  { %p178_p9 = pnand %p176_p8, %p173_p7 }
 0x184   :  { %181 = shalt.err (!%p178_p9)
}
 0x185   :  { %98 = dma.vmem_to_hbm [thread:$0]  %s96_s4, 16, %s249_s2, [#allocation4]  }
 0x186   :  { %186 = dma.done.wait [#allocation4], 16  }
 0x187   :  { %187 = vsyncadd [#allocation4], 4294967280 }
 0x188   :  { %102 = vsyncpa [#allocation3], 1 }
 0x189   :  { %103 = vsyncpa [#allocation6], 1 }
 0x18a   :  { %104 = vsyncpa [#allocation4], 1 }

</bundles_post_ra>
